<compile_context>
chip_gen: v7x
topology: tpu7x:2x2x1
jax: 0.10.0
libtpu: 0.0.40
codegen_flags: <defaults>
</compile_context>

<pallas_src>
import functools

import jax
import jax.numpy as jnp
from jax.experimental import pallas as pl
from jax.experimental.pallas import tpu as pltpu


def _round_up(v, m):
    return (v + m - 1) // m * m


def _network_kernel(
    x_ref, a_ref,
    wx_ref, bx_ref,      # fused AE1|AE2      : (Din, 2H), (1, 2H)
    wa_ref, ba_ref,      # fused SE1|SE2      : (Dn,  2H), (1, 2H)
    wh_ref, bh_ref,      # fused mean|disp|pi : (H, 3H),   (1, 3H)
    z1_ref, z2_ref, e1_ref, e2_ref, h_ref, mean_ref, disp_ref, pi_ref,
    *, hidden_dim,
):
    H = hidden_dim
    mm_dtype = wx_ref.dtype                 # matmul operand dtype (bf16 or f32)
    x = x_ref[...].astype(mm_dtype)
    a = a_ref[...].astype(mm_dtype)

    def sigmoid(v):
        # sigmoid(x) == 0.5*(tanh(x/2)+1): one EUP push per element instead of
        # exp + reciprocal (EUP has a single slot/cycle on v5e/v6e/v7x).
        return 0.5 * (jnp.tanh(0.5 * v) + 1.0)

    def norm_rows(v):
        # F.normalize(v, dim=1, p=2) == v / max(||v||, 1e-12)
        #                            == v * rsqrt(max(sum(v^2), 1e-24))
        ss = jnp.sum(v * v, axis=1, keepdims=True)
        return v * jax.lax.rsqrt(jnp.maximum(ss, 1e-24))

    # Fused encoder matmuls (one wide MXU pass per input, f32 accumulation).
    zx = sigmoid(jnp.dot(x, wx_ref[...], preferred_element_type=jnp.float32)
                 + bx_ref[...])
    ea = jnp.dot(a, wa_ref[...], preferred_element_type=jnp.float32) + ba_ref[...]

    z1 = norm_rows(zx[:, :H])
    z2 = norm_rows(zx[:, H:])
    e1 = norm_rows(ea[:, :H])
    e2 = norm_rows(ea[:, H:])
    h = (z1 + z2 + e1 + e2) * 0.25

    # Fused head matmul.
    hh = jnp.dot(h.astype(mm_dtype), wh_ref[...],
                 preferred_element_type=jnp.float32) + bh_ref[...]
    mean = jnp.clip(jnp.exp(hh[:, :H]), 1e-5, 1e6)                # MeanAct
    disp = jnp.clip(jax.nn.softplus(hh[:, H:2 * H]), 1e-4, 1e4)   # DispAct
    pi = sigmoid(hh[:, 2 * H:])

    # Eight direct stores (one per output): no concatenate, no packed slab.
    z1_ref[...] = z1
    z2_ref[...] = z2
    e1_ref[...] = e1
    e2_ref[...] = e2
    h_ref[...] = h
    mean_ref[...] = mean
    disp_ref[...] = disp
    pi_ref[...] = pi


def fuse_params(params, matmul_dtype=jnp.bfloat16):
    """Fuse the parallel linears into wide weights ONCE (outside the hot path).

    Weights are stored pre-transposed (in, out) and cast to the MXU operand
    dtype (bf16 recommended on v6e/v7x); biases stay f32 (added after the f32
    accumulation).
    """
    cat = lambda ks: jnp.concatenate([params[k] for k in ks], axis=1)
    return {
        "wx": cat(("wae1", "wae2")).astype(matmul_dtype),   # (Din, 2H)
        "bx": cat(("bae1", "bae2")).astype(jnp.float32),    # (1, 2H)
        "wa": cat(("wse1", "wse2")).astype(matmul_dtype),   # (Dn, 2H)
        "ba": cat(("bse1", "bse2")).astype(jnp.float32),    # (1, 2H)
        "wh": cat(("wm", "wd", "wp")).astype(matmul_dtype),  # (H, 3H)
        "bh": cat(("bm", "bd", "bp")).astype(jnp.float32),   # (1, 3H)
    }


def _choose_row_tile(N, input_dim, n_num, H, weight_itemsize, tile_cap):
    """Derive the row tile + vmem limit from the actual chip's VMEM capacity."""
    try:
        vmem_cap = pltpu.get_tpu_info().vmem_capacity_bytes
    except Exception:       # query unavailable -> assume v7x (smallest: 64 MiB)
        vmem_cap = 64 << 20
    budget = int(0.75 * vmem_cap)

    weight_bytes = (weight_itemsize * (input_dim * 2 * H + n_num * 2 * H + H * 3 * H)
                    + 4 * 7 * H)
    # The default pipeline double-buffers every input, including the
    # grid-invariant weights (single-buffering them would halve this term).
    resident_bytes = 2 * weight_bytes
    # Per-row VMEM: double-buffered f32 x/A input tiles + 8 double-buffered f32
    # output tiles + ~12H f32 of compute temporaries (zx, ea, hh, z1..h).
    per_row = 2 * 4 * (input_dim + n_num) + 2 * 4 * 8 * H + 4 * 12 * H

    avail = budget - resident_bytes
    if avail < 8 * per_row:
        # TODO(synk): K-tile the encoder weights (grid axis over input_dim with
        # a VMEM f32 accumulator) when the fused weights alone blow the budget.
        raise ValueError(
            f"fused weights ({resident_bytes} B) leave no room for a row tile "
            f"inside the {budget} B VMEM budget; K-tiling over input_dim needed")

    tile = min(tile_cap, avail // per_row)
    n8 = _round_up(max(N, 1), 8)
    # Keep >= ~4 grid steps when N allows it so both v7x TensorCores get >= 2
    # blocks each under "parallel" semantics (no effect on 1-TC v5e/v6e).
    tile = min(tile, _round_up(pl.cdiv(n8, 4), 8), n8)
    tile = max(8, (tile // 8) * 8)

    footprint = resident_bytes + tile * per_row + (8 << 20)       # + headroom
    vmem_limit = int(min(max(footprint, 32 << 20), budget))
    return tile, weight_bytes, vmem_limit


@functools.partial(jax.jit, static_argnames=("tile_cap",))
def network_forward(x, A, fused, tile_cap=512):
    """Full Network.forward as one row-tiled Pallas kernel.

    x: (N, input_dim) f32, A: (N, n_num) f32, fused = fuse_params(params).
    Returns (Z1, Z2, E1, E2, H, mean, disp, pi), each (N, hidden_dim) f32.
    """
    N, input_dim = x.shape
    n_num = A.shape[1]
    H = fused["wh"].shape[0]
    f32 = jnp.float32

    tile, weight_bytes, vmem_limit = _choose_row_tile(
        N, input_dim, n_num, H, jnp.dtype(fused["wx"].dtype).itemsize, tile_cap)
    # No padding of N: the partial last block (if any) reads row-local padding
    # and its out-of-range output rows are masked on store.
    grid = (pl.cdiv(N, tile),)

    flops = 2 * N * (input_dim * 2 * H + n_num * 2 * H + H * 3 * H)
    transcendentals = 6 * N * H       # tanh(2H) + exp(H) + softplus(~2H) + tanh(H)
    bytes_accessed = 4 * N * (input_dim + n_num + 8 * H) + weight_bytes

    def row_spec(d):
        return pl.BlockSpec((tile, d), lambda i: (i, 0))

    def resident(shp):
        return pl.BlockSpec(shp, lambda i: (0, 0))

    out_shape = tuple(jax.ShapeDtypeStruct((N, H), f32) for _ in range(8))
    out_specs = tuple(row_spec(H) for _ in range(8))

    outs = pl.pallas_call(
        functools.partial(_network_kernel, hidden_dim=H),
        out_shape=out_shape,
        grid=grid,
        in_specs=[
            row_spec(input_dim), row_spec(n_num),
            resident((input_dim, 2 * H)), resident((1, 2 * H)),
            resident((n_num, 2 * H)), resident((1, 2 * H)),
            resident((H, 3 * H)), resident((1, 3 * H)),
        ],
        out_specs=out_specs,
        compiler_params=pltpu.CompilerParams(
            dimension_semantics=("parallel",),
            vmem_limit_bytes=vmem_limit,
        ),
        cost_estimate=pl.CostEstimate(
            flops=flops,
            transcendentals=transcendentals,
            bytes_accessed=bytes_accessed,
        ),
    )(x, A, fused["wx"], fused["bx"], fused["wa"], fused["ba"],
      fused["wh"], fused["bh"])
    return outs  # (Z1, Z2, E1, E2, H, mean, disp, pi)


def init_params(key, input_dim, hidden_dim, n_num):
    """Deterministic synthetic parameter init (shapes match nn.Linear)."""
    def linear_init(k, fan_in, fan_out):
        kw, kb = jax.random.split(k)
        bound = 1.0 / jnp.sqrt(fan_in)
        # Stored pre-transposed: (in, out).
        w = jax.random.uniform(kw, (fan_in, fan_out), jnp.float32, -bound, bound)
        b = jax.random.uniform(kb, (1, fan_out), jnp.float32, -bound, bound)
        return w, b

    keys = jax.random.split(key, 7)
    p = {}
    p["wae1"], p["bae1"] = linear_init(keys[0], input_dim, hidden_dim)
    p["wae2"], p["bae2"] = linear_init(keys[1], input_dim, hidden_dim)
    p["wse1"], p["bse1"] = linear_init(keys[2], n_num, hidden_dim)
    p["wse2"], p["bse2"] = linear_init(keys[3], n_num, hidden_dim)
    p["wm"], p["bm"] = linear_init(keys[4], hidden_dim, hidden_dim)
    p["wd"], p["bd"] = linear_init(keys[5], hidden_dim, hidden_dim)
    p["wp"], p["bp"] = linear_init(keys[6], hidden_dim, hidden_dim)
    return p


def _reference_forward(x, A, params):
    """Pure-JAX reference mirroring the PyTorch module (f32)."""
    def lin(v, w, b):
        return v @ w + b

    def normalize(v):
        n = jnp.linalg.norm(v, axis=1, keepdims=True)
        return v / jnp.maximum(n, 1e-12)

    z1 = normalize(jax.nn.sigmoid(lin(x, params["wae1"], params["bae1"])))
    z2 = normalize(jax.nn.sigmoid(lin(x, params["wae2"], params["bae2"])))
    e1 = normalize(lin(A, params["wse1"], params["bse1"]))
    e2 = normalize(lin(A, params["wse2"], params["bse2"]))
    h = (z1 + z2 + e1 + e2) / 4.0
    mean = jnp.clip(jnp.exp(lin(h, params["wm"], params["bm"])), 1e-5, 1e6)
    disp = jnp.clip(jax.nn.softplus(lin(h, params["wd"], params["bd"])), 1e-4, 1e4)
    pi = jax.nn.sigmoid(lin(h, params["wp"], params["bp"]))
    return z1, z2, e1, e2, h, mean, disp, pi


if __name__ == "__main__":
    input_dim, hidden_dim, n_num = 16, 32, 8

    key = jax.random.PRNGKey(0)
    kx, ka, kp = jax.random.split(key, 3)
    params = init_params(kp, input_dim, hidden_dim, n_num)

    def run_case(N, fused, rtol, atol):
        kxn, kan = jax.random.split(jax.random.fold_in(kx, N))
        x = jax.random.normal(kxn, (N, input_dim), jnp.float32)
        A = jax.random.normal(kan, (N, n_num), jnp.float32)

        outs = jax.block_until_ready(network_forward(x, A, fused))
        refs = _reference_forward(x, A, params)

        Z1 = outs[0]
        assert Z1.shape == (N, hidden_dim)
        assert jnp.allclose(jnp.linalg.norm(Z1, axis=1), 1.0, atol=1e-3)
        for got, want in zip(outs, refs):
            assert got.shape == (N, hidden_dim)
            assert jnp.allclose(got, want, rtol=rtol, atol=atol), \
                "mismatch vs reference"

    # f32 matmul operands: tight check against the pure-JAX reference.
    fused_f32 = fuse_params(params, matmul_dtype=jnp.float32)
    run_case(8, fused_f32, rtol=2e-4, atol=2e-4)

    # bf16 matmul operands (recommended on v6e/v7x) with an N that is not a
    # multiple of the row tile (exercises the masked partial last block).
    fused_bf16 = fuse_params(params, matmul_dtype=jnp.bfloat16)
    run_case(50, fused_bf16, rtol=6e-2, atol=6e-2)

    print("KERNEL_OK")
</pallas_src>

<mosaic_0001>
module attributes {stable_mosaic.version = 11 : i64} {
  func.func @_network_kernel(%arg0: i32, %arg1: memref<8x16xf32, #tpu.memory_space<vmem>>, %arg2: memref<8x8xf32, #tpu.memory_space<vmem>>, %arg3: memref<16x64xf32, #tpu.memory_space<vmem>>, %arg4: memref<1x64xf32, #tpu.memory_space<vmem>>, %arg5: memref<8x64xf32, #tpu.memory_space<vmem>>, %arg6: memref<1x64xf32, #tpu.memory_space<vmem>>, %arg7: memref<32x96xf32, #tpu.memory_space<vmem>>, %arg8: memref<1x96xf32, #tpu.memory_space<vmem>>, %arg9: memref<8x32xf32, #tpu.memory_space<vmem>>, %arg10: memref<8x32xf32, #tpu.memory_space<vmem>>, %arg11: memref<8x32xf32, #tpu.memory_space<vmem>>, %arg12: memref<8x32xf32, #tpu.memory_space<vmem>>, %arg13: memref<8x32xf32, #tpu.memory_space<vmem>>, %arg14: memref<8x32xf32, #tpu.memory_space<vmem>>, %arg15: memref<8x32xf32, #tpu.memory_space<vmem>>, %arg16: memref<8x32xf32, #tpu.memory_space<vmem>>) attributes {dimension_semantics = [#tpu.dimension_semantics<parallel>], iteration_bounds = array<i64: 1>, scalar_prefetch = 0 : i64, scratch_operands = 0 : i64, tpu.core_type = #tpu.core_type<tc>, window_params = [{transform_indices = @transform_0, window_bounds = array<i64: 8, 16>}, {transform_indices = @transform_1, window_bounds = array<i64: 8, 8>}, {pipeline_mode = #tpu.pipeline_mode<synchronous>, transform_indices = @transform_2, window_bounds = array<i64: 16, 64>}, {pipeline_mode = #tpu.pipeline_mode<synchronous>, transform_indices = @transform_3, window_bounds = array<i64: 1, 64>}, {pipeline_mode = #tpu.pipeline_mode<synchronous>, transform_indices = @transform_4, window_bounds = array<i64: 8, 64>}, {pipeline_mode = #tpu.pipeline_mode<synchronous>, transform_indices = @transform_5, window_bounds = array<i64: 1, 64>}, {pipeline_mode = #tpu.pipeline_mode<synchronous>, transform_indices = @transform_6, window_bounds = array<i64: 32, 96>}, {pipeline_mode = #tpu.pipeline_mode<synchronous>, transform_indices = @transform_7, window_bounds = array<i64: 1, 96>}, {transform_indices = @transform_8, window_bounds = array<i64: 8, 32>}, {transform_indices = @transform_9, window_bounds = array<i64: 8, 32>}, {transform_indices = @transform_10, window_bounds = array<i64: 8, 32>}, {transform_indices = @transform_11, window_bounds = array<i64: 8, 32>}, {transform_indices = @transform_12, window_bounds = array<i64: 8, 32>}, {transform_indices = @transform_13, window_bounds = array<i64: 8, 32>}, {transform_indices = @transform_14, window_bounds = array<i64: 8, 32>}, {transform_indices = @transform_15, window_bounds = array<i64: 8, 32>}]} {
    %c0 = arith.constant 0 : index
    %c0_0 = arith.constant 0 : index
    %0 = vector.load %arg1[%c0, %c0_0] : memref<8x16xf32, #tpu.memory_space<vmem>>, vector<8x16xf32>
    %c0_1 = arith.constant 0 : index
    %c0_2 = arith.constant 0 : index
    %1 = vector.load %arg2[%c0_1, %c0_2] : memref<8x8xf32, #tpu.memory_space<vmem>>, vector<8x8xf32>
    %c0_3 = arith.constant 0 : index
    %c0_4 = arith.constant 0 : index
    %2 = vector.load %arg3[%c0_3, %c0_4] : memref<16x64xf32, #tpu.memory_space<vmem>>, vector<16x64xf32>
    %cst = arith.constant dense<0.000000e+00> : vector<8x64xf32>
    %3 = tpu.matmul %0, %2, %cst {dimension_numbers = #tpu.dot_dimension_numbers<[1], [0], [0], [1], [0, 0, 1, 1], [], []>} : vector<8x16xf32>, vector<16x64xf32>, vector<8x64xf32> -> vector<8x64xf32>
    %c0_5 = arith.constant 0 : index
    %c0_6 = arith.constant 0 : index
    %4 = vector.load %arg4[%c0_5, %c0_6] : memref<1x64xf32, #tpu.memory_space<vmem>>, vector<1x64xf32>
    %5 = vector.broadcast %4 : vector<1x64xf32> to vector<8x64xf32>
    %6 = arith.addf %3, %5 : vector<8x64xf32>
    %cst_7 = arith.constant 5.000000e-01 : f32
    %7 = vector.broadcast %cst_7 : f32 to vector<8x64xf32>
    %8 = arith.mulf %7, %6 : vector<8x64xf32>
    %9 = math.tanh %8 : vector<8x64xf32>
    %cst_8 = arith.constant 1.000000e+00 : f32
    %10 = vector.broadcast %cst_8 : f32 to vector<8x64xf32>
    %11 = arith.addf %9, %10 : vector<8x64xf32>
    %cst_9 = arith.constant 5.000000e-01 : f32
    %12 = vector.broadcast %cst_9 : f32 to vector<8x64xf32>
    %13 = arith.mulf %12, %11 : vector<8x64xf32>
    %c0_10 = arith.constant 0 : index
    %c0_11 = arith.constant 0 : index
    %14 = vector.load %arg5[%c0_10, %c0_11] : memref<8x64xf32, #tpu.memory_space<vmem>>, vector<8x64xf32>
    %cst_12 = arith.constant dense<0.000000e+00> : vector<8x64xf32>
    %15 = tpu.matmul %1, %14, %cst_12 {dimension_numbers = #tpu.dot_dimension_numbers<[1], [0], [0], [1], [0, 0, 1, 1], [], []>} : vector<8x8xf32>, vector<8x64xf32>, vector<8x64xf32> -> vector<8x64xf32>
    %c0_13 = arith.constant 0 : index
    %c0_14 = arith.constant 0 : index
    %16 = vector.load %arg6[%c0_13, %c0_14] : memref<1x64xf32, #tpu.memory_space<vmem>>, vector<1x64xf32>
    %17 = vector.broadcast %16 : vector<1x64xf32> to vector<8x64xf32>
    %18 = arith.addf %15, %17 : vector<8x64xf32>
    %19 = vector.extract_strided_slice %13 {offsets = [0, 0], sizes = [8, 32], strides = [1, 1]} : vector<8x64xf32> to vector<8x32xf32>
    %20 = arith.mulf %19, %19 : vector<8x32xf32>
    %cst_15 = arith.constant dense<0.000000e+00> : vector<8xf32>
    %21 = vector.multi_reduction <add>, %20, %cst_15 [1] : vector<8x32xf32> to vector<8xf32>
    %22 = vector.shape_cast %21 : vector<8xf32> to vector<8x1xf32>
    %cst_16 = arith.constant 1.000000e-24 : f32
    %23 = vector.broadcast %cst_16 : f32 to vector<8x1xf32>
    %24 = arith.maximumf %22, %23 : vector<8x1xf32>
    %25 = math.rsqrt %24 : vector<8x1xf32>
    %26 = vector.broadcast %25 : vector<8x1xf32> to vector<8x32xf32>
    %27 = arith.mulf %19, %26 : vector<8x32xf32>
    %28 = vector.extract_strided_slice %13 {offsets = [0, 32], sizes = [8, 32], strides = [1, 1]} : vector<8x64xf32> to vector<8x32xf32>
    %29 = arith.mulf %28, %28 : vector<8x32xf32>
    %cst_17 = arith.constant dense<0.000000e+00> : vector<8xf32>
    %30 = vector.multi_reduction <add>, %29, %cst_17 [1] : vector<8x32xf32> to vector<8xf32>
    %31 = vector.shape_cast %30 : vector<8xf32> to vector<8x1xf32>
    %cst_18 = arith.constant 1.000000e-24 : f32
    %32 = vector.broadcast %cst_18 : f32 to vector<8x1xf32>
    %33 = arith.maximumf %31, %32 : vector<8x1xf32>
    %34 = math.rsqrt %33 : vector<8x1xf32>
    %35 = vector.broadcast %34 : vector<8x1xf32> to vector<8x32xf32>
    %36 = arith.mulf %28, %35 : vector<8x32xf32>
    %37 = vector.extract_strided_slice %18 {offsets = [0, 0], sizes = [8, 32], strides = [1, 1]} : vector<8x64xf32> to vector<8x32xf32>
    %38 = arith.mulf %37, %37 : vector<8x32xf32>
    %cst_19 = arith.constant dense<0.000000e+00> : vector<8xf32>
    %39 = vector.multi_reduction <add>, %38, %cst_19 [1] : vector<8x32xf32> to vector<8xf32>
    %40 = vector.shape_cast %39 : vector<8xf32> to vector<8x1xf32>
    %cst_20 = arith.constant 1.000000e-24 : f32
    %41 = vector.broadcast %cst_20 : f32 to vector<8x1xf32>
    %42 = arith.maximumf %40, %41 : vector<8x1xf32>
    %43 = math.rsqrt %42 : vector<8x1xf32>
    %44 = vector.broadcast %43 : vector<8x1xf32> to vector<8x32xf32>
    %45 = arith.mulf %37, %44 : vector<8x32xf32>
    %46 = vector.extract_strided_slice %18 {offsets = [0, 32], sizes = [8, 32], strides = [1, 1]} : vector<8x64xf32> to vector<8x32xf32>
    %47 = arith.mulf %46, %46 : vector<8x32xf32>
    %cst_21 = arith.constant dense<0.000000e+00> : vector<8xf32>
    %48 = vector.multi_reduction <add>, %47, %cst_21 [1] : vector<8x32xf32> to vector<8xf32>
    %49 = vector.shape_cast %48 : vector<8xf32> to vector<8x1xf32>
    %cst_22 = arith.constant 1.000000e-24 : f32
    %50 = vector.broadcast %cst_22 : f32 to vector<8x1xf32>
    %51 = arith.maximumf %49, %50 : vector<8x1xf32>
    %52 = math.rsqrt %51 : vector<8x1xf32>
    %53 = vector.broadcast %52 : vector<8x1xf32> to vector<8x32xf32>
    %54 = arith.mulf %46, %53 : vector<8x32xf32>
    %55 = arith.addf %27, %36 : vector<8x32xf32>
    %56 = arith.addf %55, %45 : vector<8x32xf32>
    %57 = arith.addf %56, %54 : vector<8x32xf32>
    %cst_23 = arith.constant 2.500000e-01 : f32
    %58 = vector.broadcast %cst_23 : f32 to vector<8x32xf32>
    %59 = arith.mulf %57, %58 : vector<8x32xf32>
    %c0_24 = arith.constant 0 : index
    %c0_25 = arith.constant 0 : index
    %60 = vector.load %arg7[%c0_24, %c0_25] : memref<32x96xf32, #tpu.memory_space<vmem>>, vector<32x96xf32>
    %cst_26 = arith.constant dense<0.000000e+00> : vector<8x96xf32>
    %61 = tpu.matmul %59, %60, %cst_26 {dimension_numbers = #tpu.dot_dimension_numbers<[1], [0], [0], [1], [0, 0, 1, 1], [], []>} : vector<8x32xf32>, vector<32x96xf32>, vector<8x96xf32> -> vector<8x96xf32>
    %c0_27 = arith.constant 0 : index
    %c0_28 = arith.constant 0 : index
    %62 = vector.load %arg8[%c0_27, %c0_28] : memref<1x96xf32, #tpu.memory_space<vmem>>, vector<1x96xf32>
    %63 = vector.broadcast %62 : vector<1x96xf32> to vector<8x96xf32>
    %64 = arith.addf %61, %63 : vector<8x96xf32>
    %65 = vector.extract_strided_slice %64 {offsets = [0, 0], sizes = [8, 32], strides = [1, 1]} : vector<8x96xf32> to vector<8x32xf32>
    %66 = math.exp %65 : vector<8x32xf32>
    %cst_29 = arith.constant 9.99999974E-6 : f32
    %cst_30 = arith.constant 1.000000e+06 : f32
    %67 = vector.broadcast %cst_29 : f32 to vector<8x32xf32>
    %68 = arith.maximumf %67, %66 : vector<8x32xf32>
    %69 = vector.broadcast %cst_30 : f32 to vector<8x32xf32>
    %70 = arith.minimumf %69, %68 : vector<8x32xf32>
    %71 = vector.extract_strided_slice %64 {offsets = [0, 32], sizes = [8, 32], strides = [1, 1]} : vector<8x96xf32> to vector<8x32xf32>
    %cst_31 = arith.constant 0.000000e+00 : f32
    %72 = vector.broadcast %cst_31 : f32 to vector<8x32xf32>
    %73 = arith.maximumf %71, %72 : vector<8x32xf32>
    %74 = vector.broadcast %cst_31 : f32 to vector<8x32xf32>
    %75 = arith.subf %71, %74 : vector<8x32xf32>
    %76 = arith.cmpf one, %75, %75 : vector<8x32xf32>
    %77 = vector.broadcast %cst_31 : f32 to vector<8x32xf32>
    %78 = arith.addf %71, %77 : vector<8x32xf32>
    %79 = math.absf %75 : vector<8x32xf32>
    %cst_32 = arith.constant 0.000000e+00 : f32
    %80 = vector.broadcast %cst_32 : f32 to vector<8x32xf32>
    %81 = arith.subf %80, %79 : vector<8x32xf32>
    %82 = math.exp %81 : vector<8x32xf32>
    %83 = math.log1p %82 : vector<8x32xf32>
    %84 = arith.addf %73, %83 : vector<8x32xf32>
    %85 = arith.select %76, %78, %84 : vector<8x32xi1>, vector<8x32xf32>
    %cst_33 = arith.constant 9.99999974E-5 : f32
    %cst_34 = arith.constant 1.000000e+04 : f32
    %86 = vector.broadcast %cst_33 : f32 to vector<8x32xf32>
    %87 = arith.maximumf %86, %85 : vector<8x32xf32>
    %88 = vector.broadcast %cst_34 : f32 to vector<8x32xf32>
    %89 = arith.minimumf %88, %87 : vector<8x32xf32>
    %90 = vector.extract_strided_slice %64 {offsets = [0, 64], sizes = [8, 32], strides = [1, 1]} : vector<8x96xf32> to vector<8x32xf32>
    %cst_35 = arith.constant 5.000000e-01 : f32
    %91 = vector.broadcast %cst_35 : f32 to vector<8x32xf32>
    %92 = arith.mulf %91, %90 : vector<8x32xf32>
    %93 = math.tanh %92 : vector<8x32xf32>
    %cst_36 = arith.constant 1.000000e+00 : f32
    %94 = vector.broadcast %cst_36 : f32 to vector<8x32xf32>
    %95 = arith.addf %93, %94 : vector<8x32xf32>
    %cst_37 = arith.constant 5.000000e-01 : f32
    %96 = vector.broadcast %cst_37 : f32 to vector<8x32xf32>
    %97 = arith.mulf %96, %95 : vector<8x32xf32>
    %c0_38 = arith.constant 0 : index
    %c0_39 = arith.constant 0 : index
    %98 = vector.load %arg9[%c0_38, %c0_39] : memref<8x32xf32, #tpu.memory_space<vmem>>, vector<8x32xf32>
    tpu.vector_store %arg9[%c0_38, %c0_39], %27 {strides = array<i32>} : memref<8x32xf32, #tpu.memory_space<vmem>>, vector<8x32xf32>,
    %c0_40 = arith.constant 0 : index
    %c0_41 = arith.constant 0 : index
    %99 = vector.load %arg10[%c0_40, %c0_41] : memref<8x32xf32, #tpu.memory_space<vmem>>, vector<8x32xf32>
    tpu.vector_store %arg10[%c0_40, %c0_41], %36 {strides = array<i32>} : memref<8x32xf32, #tpu.memory_space<vmem>>, vector<8x32xf32>,
    %c0_42 = arith.constant 0 : index
    %c0_43 = arith.constant 0 : index
    %100 = vector.load %arg11[%c0_42, %c0_43] : memref<8x32xf32, #tpu.memory_space<vmem>>, vector<8x32xf32>
    tpu.vector_store %arg11[%c0_42, %c0_43], %45 {strides = array<i32>} : memref<8x32xf32, #tpu.memory_space<vmem>>, vector<8x32xf32>,
    %c0_44 = arith.constant 0 : index
    %c0_45 = arith.constant 0 : index
    %101 = vector.load %arg12[%c0_44, %c0_45] : memref<8x32xf32, #tpu.memory_space<vmem>>, vector<8x32xf32>
    tpu.vector_store %arg12[%c0_44, %c0_45], %54 {strides = array<i32>} : memref<8x32xf32, #tpu.memory_space<vmem>>, vector<8x32xf32>,
    %c0_46 = arith.constant 0 : index
    %c0_47 = arith.constant 0 : index
    %102 = vector.load %arg13[%c0_46, %c0_47] : memref<8x32xf32, #tpu.memory_space<vmem>>, vector<8x32xf32>
    tpu.vector_store %arg13[%c0_46, %c0_47], %59 {strides = array<i32>} : memref<8x32xf32, #tpu.memory_space<vmem>>, vector<8x32xf32>,
    %c0_48 = arith.constant 0 : index
    %c0_49 = arith.constant 0 : index
    %103 = vector.load %arg14[%c0_48, %c0_49] : memref<8x32xf32, #tpu.memory_space<vmem>>, vector<8x32xf32>
    tpu.vector_store %arg14[%c0_48, %c0_49], %70 {strides = array<i32>} : memref<8x32xf32, #tpu.memory_space<vmem>>, vector<8x32xf32>,
    %c0_50 = arith.constant 0 : index
    %c0_51 = arith.constant 0 : index
    %104 = vector.load %arg15[%c0_50, %c0_51] : memref<8x32xf32, #tpu.memory_space<vmem>>, vector<8x32xf32>
    tpu.vector_store %arg15[%c0_50, %c0_51], %89 {strides = array<i32>} : memref<8x32xf32, #tpu.memory_space<vmem>>, vector<8x32xf32>,
    %c0_52 = arith.constant 0 : index
    %c0_53 = arith.constant 0 : index
    %105 = vector.load %arg16[%c0_52, %c0_53] : memref<8x32xf32, #tpu.memory_space<vmem>>, vector<8x32xf32>
    tpu.vector_store %arg16[%c0_52, %c0_53], %97 {strides = array<i32>} : memref<8x32xf32, #tpu.memory_space<vmem>>, vector<8x32xf32>,
    return
  }
  func.func @transform_0(%arg0: i32) -> (i32, i32) {
    %c0_i32 = arith.constant 0 : i32
    %c0_i32_0 = arith.constant 0 : i32
    return %arg0, %c0_i32 : i32, i32
  }
  func.func @transform_1(%arg0: i32) -> (i32, i32) {
    %c0_i32 = arith.constant 0 : i32
    %c0_i32_0 = arith.constant 0 : i32
    return %arg0, %c0_i32 : i32, i32
  }
  func.func @transform_2(%arg0: i32) -> (i32, i32) {
    %c0_i32 = arith.constant 0 : i32
    %c0_i32_0 = arith.constant 0 : i32
    %c0_i32_1 = arith.constant 0 : i32
    return %c0_i32, %c0_i32_0 : i32, i32
  }
  func.func @transform_3(%arg0: i32) -> (i32, i32) {
    %c0_i32 = arith.constant 0 : i32
    %c0_i32_0 = arith.constant 0 : i32
    %c0_i32_1 = arith.constant 0 : i32
    return %c0_i32, %c0_i32_0 : i32, i32
  }
  func.func @transform_4(%arg0: i32) -> (i32, i32) {
    %c0_i32 = arith.constant 0 : i32
    %c0_i32_0 = arith.constant 0 : i32
    %c0_i32_1 = arith.constant 0 : i32
    return %c0_i32, %c0_i32_0 : i32, i32
  }
  func.func @transform_5(%arg0: i32) -> (i32, i32) {
    %c0_i32 = arith.constant 0 : i32
    %c0_i32_0 = arith.constant 0 : i32
    %c0_i32_1 = arith.constant 0 : i32
    return %c0_i32, %c0_i32_0 : i32, i32
  }
  func.func @transform_6(%arg0: i32) -> (i32, i32) {
    %c0_i32 = arith.constant 0 : i32
    %c0_i32_0 = arith.constant 0 : i32
    %c0_i32_1 = arith.constant 0 : i32
    return %c0_i32, %c0_i32_0 : i32, i32
  }
  func.func @transform_7(%arg0: i32) -> (i32, i32) {
    %c0_i32 = arith.constant 0 : i32
    %c0_i32_0 = arith.constant 0 : i32
    %c0_i32_1 = arith.constant 0 : i32
    return %c0_i32, %c0_i32_0 : i32, i32
  }
  func.func @transform_8(%arg0: i32) -> (i32, i32) {
    %c0_i32 = arith.constant 0 : i32
    %c0_i32_0 = arith.constant 0 : i32
    return %arg0, %c0_i32 : i32, i32
  }
  func.func @transform_9(%arg0: i32) -> (i32, i32) {
    %c0_i32 = arith.constant 0 : i32
    %c0_i32_0 = arith.constant 0 : i32
    return %arg0, %c0_i32 : i32, i32
  }
  func.func @transform_10(%arg0: i32) -> (i32, i32) {
    %c0_i32 = arith.constant 0 : i32
    %c0_i32_0 = arith.constant 0 : i32
    return %arg0, %c0_i32 : i32, i32
  }
  func.func @transform_11(%arg0: i32) -> (i32, i32) {
    %c0_i32 = arith.constant 0 : i32
    %c0_i32_0 = arith.constant 0 : i32
    return %arg0, %c0_i32 : i32, i32
  }
  func.func @transform_12(%arg0: i32) -> (i32, i32) {
    %c0_i32 = arith.constant 0 : i32
    %c0_i32_0 = arith.constant 0 : i32
    return %arg0, %c0_i32 : i32, i32
  }
  func.func @transform_13(%arg0: i32) -> (i32, i32) {
    %c0_i32 = arith.constant 0 : i32
    %c0_i32_0 = arith.constant 0 : i32
    return %arg0, %c0_i32 : i32, i32
  }
  func.func @transform_14(%arg0: i32) -> (i32, i32) {
    %c0_i32 = arith.constant 0 : i32
    %c0_i32_0 = arith.constant 0 : i32
    return %arg0, %c0_i32 : i32, i32
  }
  func.func @transform_15(%arg0: i32) -> (i32, i32) {
    %c0_i32 = arith.constant 0 : i32
    %c0_i32_0 = arith.constant 0 : i32
    return %arg0, %c0_i32 : i32, i32
  }
}

</mosaic_0001>

<bundles_post_ra>
// kernel: network_forward.1
= control target key start
LH: loop header
LB: loop body
LE: loop exit
PB: predicated region body
PF: predicated region fallthrough
CT: control target
= control target key end

     0   :  { %21 = vsyncpa [#allocation3], 0  ;;  %s1215_s0 = inlined_call_operand.hbm [shape: f32[8,16], index: 0, kind: input, shape index: {}]   ;;  %s1216_s1 = inlined_call_operand.hbm [shape: f32[8,8], index: 1, kind: input, shape index: {}]   ;;  %s1217_s2 = inlined_call_operand.vmem [shape: f32[16,64], index: 2, kind: input, shape index: {}]   ;;  %s1218_s3 = inlined_call_operand.vmem [shape: f32[1,64], index: 3, kind: input, shape index: {}]   ;;  %s1219_s4 = inlined_call_operand.vmem [shape: f32[8,64], index: 4, kind: input, shape index: {}]   ;;  %s1220_s5 = inlined_call_operand.vmem [shape: f32[1,64], index: 5, kind: input, shape index: {}]   ;;  %s1221_s6 = inlined_call_operand.hbm [shape: f32[32,96], index: 6, kind: input, shape index: {}]   ;;  %s1222_s7 = inlined_call_operand.hbm [shape: f32[1,96], index: 7, kind: input, shape index: {}]   ;;  %s1223_s8 = inlined_call_operand.hbm [shape: f32[8,32], index: 8, kind: output, shape index: {0}]   ;;  %s1224_s9 = inlined_call_operand.hbm [shape: f32[8,32], index: 9, kind: output, shape index: {1}]   ;;  %s1225_s10 = inlined_call_operand.hbm [shape: f32[8,32], index: 10, kind: output, shape index: {2}]   ;;  %s1226_s11 = inlined_call_operand.hbm [shape: f32[8,32], index: 11, kind: output, shape index: {3}]   ;;  %s1227_s12 = inlined_call_operand.hbm [shape: f32[8,32], index: 12, kind: output, shape index: {4}]   ;;  %s1228_s13 = inlined_call_operand.hbm [shape: f32[8,32], index: 13, kind: output, shape index: {5}]   ;;  %s1229_s14 = inlined_call_operand.hbm [shape: f32[8,32], index: 14, kind: output, shape index: {6}]   ;;  %s1230_s15 = inlined_call_operand.hbm [shape: f32[8,32], index: 15, kind: output, shape index: {7}]  }
   0x1   :  { %22 = vsyncpa [#allocation6], 0 }
   0x2   :  { %23 = vsyncpa [#allocation9], 0 }
   0x3   :  { %24 = vsyncpa [#allocation4], 0 }
   0x4   :  { %25 = vsyncpa [#allocation12], 0 }
   0x5   :  { %26 = vsyncpa [#allocation15], 0 }
   0x6   :  { %27 = vsyncpa [#allocation18], 0 }
   0x7   :  { %28 = vsyncpa [#allocation21], 0  ;;  %s914_s18 = smov [#allocation5]   ;;  %s915_s20 = smov [#allocation2]  }
   0x8   :  { %s45_s19 = sshll.u32 %s914_s18, 4  ;;  %s35_s21 = sshll.u32 %s915_s20, 4  ;;  %s46_s19 = int_to_ptr.vmem [resolvable:$true] %s45_s19  ;;  %s36_s21 = int_to_ptr.vmem [resolvable:$true] %s35_s21 }
   0x9   :  { %s634_s24 = scalar_lea.hbm %s1216_s1, 128 }
   0xa   :  { %p635_p0 = scmp.ne.s32.totalorder %s1216_s1, %s634_s24  ;;  %p638_p1 = scmp.lt.u32.totalorder %s634_s24, %s1216_s1 }
   0xc   :  { %p640_p2 = pnand %p638_p1, %p635_p0 }
   0xe   :  { %643 = shalt.err (!%p640_p2)
}
   0xf   :  { %s644_s29 = scalar_lea.vmem %s46_s19, 128  ;;  %p649_p4 = scmp.lt.s32.totalorder %s46_s19, %s46_s19 }
  0x10   :  { %p645_p3 = scmp.ne.s32.totalorder %s46_s19, %s644_s29  ;;  %p650_p5 = scmp.lt.s32.totalorder %s644_s29, %s644_s29 }
  0x12   :  { %p651_p6 = por %p650_p5, %p649_p4 }
  0x14   :  { %p652_p7 = pnand %p651_p6, %p645_p3 }
  0x16   :  { %655 = shalt.err (!%p652_p7)
}
  0x17   :  { %48 = dma.hbm_to_vmem [thread:$0]  %s1216_s1, 128, %s46_s19, [#allocation6]  }
  0x18   :  { %s656_s20 = scalar_lea.hbm %s1215_s0, 128 }
  0x19   :  { %p657_p8 = scmp.ne.s32.totalorder %s1215_s0, %s656_s20  ;;  %p660_p9 = scmp.lt.u32.totalorder %s656_s20, %s1215_s0 }
  0x1b   :  { %p662_p10 = pnand %p660_p9, %p657_p8 }
  0x1d   :  { %665 = shalt.err (!%p662_p10)
}
  0x1e   :  { %s666_s26 = scalar_lea.vmem %s36_s21, 128  ;;  %p671_p12 = scmp.lt.s32.totalorder %s36_s21, %s36_s21 }
  0x1f   :  { %p667_p11 = scmp.ne.s32.totalorder %s36_s21, %s666_s26  ;;  %p672_p13 = scmp.lt.s32.totalorder %s666_s26, %s666_s26 }
  0x21   :  { %p673_p0 = por %p672_p13, %p671_p12 }
  0x23   :  { %p674_p1 = pnand %p673_p0, %p667_p11 }
  0x25   :  { %677 = shalt.err (!%p674_p1)
}
  0x26   :  { %38 = dma.hbm_to_vmem [thread:$0]  %s1215_s0, 128, %s36_s21, [#allocation3]  }
  0x27   :  { %s916_s27 = smov [#allocation7]   ;;  %s678_s16 = scalar_lea.hbm %s1221_s6, 512 }
  0x28   :  { %s62_s28 = sshll.u32 %s916_s27, 4  ;;  %p679_p2 = scmp.ne.s32.totalorder %s1221_s6, %s678_s16  ;;  %s63_s28 = int_to_ptr.vmem [resolvable:$true] %s62_s28 }
  0x29   :  { %p682_p3 = scmp.lt.u32.totalorder %s678_s16, %s1221_s6 }
  0x2b   :  { %p684_p4 = pnand %p682_p3, %p679_p2 }
  0x2d   :  { %687 = shalt.err (!%p684_p4)
}
  0x2e   :  { %s688_s23 = scalar_lea.vmem %s63_s28, 512  ;;  %p693_p6 = scmp.lt.s32.totalorder %s63_s28, %s63_s28 }
  0x2f   :  { %p689_p5 = scmp.ne.s32.totalorder %s63_s28, %s688_s23  ;;  %p694_p7 = scmp.lt.s32.totalorder %s688_s23, %s688_s23 }
  0x31   :  { %p695_p8 = por %p694_p7, %p693_p6 }
  0x33   :  { %p696_p9 = pnand %p695_p8, %p689_p5 }
  0x35   :  { %699 = shalt.err (!%p696_p9)
}
  0x36   :  { %s917_s0 = smov 128   ;;  %s918_s21 = smov 8  }
  0x37   :  { %68 = dma.hbm_to_vmem [thread:$0]  %s1221_s6, 512, %s63_s28, [#allocation6], %s917_s0, %s917_s0, %s918_s21  }
  0x38   :  { %s919_s26 = smov [#allocation8]   ;;  %s700_s29 = scalar_lea.hbm %s1222_s7, 16 }
  0x39   :  { %s75_s1 = sshll.u32 %s919_s26, 4  ;;  %p701_p10 = scmp.ne.s32.totalorder %s1222_s7, %s700_s29  ;;  %s76_s1 = int_to_ptr.vmem [resolvable:$true] %s75_s1 }
  0x3a   :  { %p704_p11 = scmp.lt.u32.totalorder %s700_s29, %s1222_s7 }
  0x3c   :  { %p706_p12 = pnand %p704_p11, %p701_p10 }
  0x3e   :  { %709 = shalt.err (!%p706_p12)
}
  0x3f   :  { %s710_s20 = scalar_lea.vmem %s76_s1, 16  ;;  %s714_s6 = scalar_lea.vmem %s76_s1, 32 }
  0x40   :  { %p711_p13 = scmp.ne.s32.totalorder %s76_s1, %s710_s20  ;;  %p715_p0 = scmp.lt.s32.totalorder %s76_s1, %s76_s1 }
  0x41   :  { %p716_p1 = scmp.lt.s32.totalorder %s714_s6, %s710_s20 }
  0x43   :  { %p717_p2 = por %p716_p1, %p715_p0 }
  0x45   :  { %p718_p3 = pnand %p717_p2, %p711_p13 }
  0x47   :  { %721 = shalt.err (!%p718_p3)
}
  0x48   :  { %78 = dma.hbm_to_vmem [thread:$0]  %s1222_s7, 16, %s76_s1, [#allocation9]  }
  0x49   :  { %898 = dma.done.wait [#allocation3], 128  }
  0x4a   :  { %899 = vsyncadd [#allocation3], 4294967168 }
  0x4b   :  { %900 = dma.done.wait [#allocation6], 640  }
  0x4c   :  { %901 = vsyncadd [#allocation6], 4294966656 }
  0x4d   :  { %902 = dma.done.wait [#allocation9], 16  }
  0x4e   :  { %903 = vsyncadd [#allocation9], 4294967280  ;;  %v920_v0 = vmov 0.0|0.0   ;;  %vm921_vm0 = vmmov 0   ;;  %v922_v1 = vmov 0.0   ;;  %v93_v2 = vld [vmem:[%s1217_s2] sm:$0xff] }
  0x4f   :  { %588 = vmatprep.subr.bf16.mxu0 %v920_v0  ;;  %569 = vmatprep.mubr.msk.f32.mxu0 %vm921_vm0, %v922_v1  ;;  %v94_v3 = vld [vmem:[%s1217_s2 + $0x8] sm:$0xff]  ;;  %v91_v5 = vld [vmem:[#allocation2] sm:$0xff]  ;;  %vm102_vm1 = vcmask 130048   ;;  %v180_v6 = vld [vmem:[%s1219_s4] sm:$0xff]  ;;  %vm188_vm2 = vcmask 64512   ;;  %s923_s19 = smov 96  }
  0x50   :  { %591 = vmatprep.subr.bf16.mxu1 %v920_v0  ;;  %585 = vmatprep.mubr.msk.f32.mxu1 %vm921_vm0, %v922_v1  ;;  %v589_v4 = vpack.c.bf16 %v94_v3, %v93_v2  ;;  %v92_v7 = vld [vmem:[#allocation5] sm:$0xff]  ;;  %v549_v8 = vld [vmem:[%s1218_s3] ss:$0 sm:$0xff]  ;;  %vm263_vm3 = vcmask 261120   ;;  %v310_v35 = vld [vmem:[#allocation7 + $0x8] sm:$0xff]  ;;  %s924_s3 = smov [#allocation11]  }
  0x51   :  { %v551_v16 = vld [vmem:[%s1220_s5] ss:$0 sm:$0xff]  ;;  %v311_v39 = vld [vmem:[#allocation7 + $0x10] sm:$0xff]  ;;  %v312_v40 = vld [vmem:[#allocation7 + $0x18] sm:$0xff]  ;;  %s453_s5 = sshll.u32 %s924_s3, 4  ;;  %s925_s27 = smov [#allocation14]   ;;  %s454_s5 = int_to_ptr.vmem [resolvable:$true] %s453_s5 }
  0x52   :  { %590 = vmatpush3.bf16.msra.mxu0 %v589_v4  ;;  %v309_v34 = vld [vmem:[#allocation7] sm:$0xff]  ;;  %v595_v41 = vpack.c.bf16 %v312_v40, %v311_v39  ;;  %s473_s29 = sshll.u32 %s925_s27, 4  ;;  %s722_s30 = scalar_lea.vmem %s454_s5, 128  ;;  %s1099_s29 = int_to_ptr.vmem [resolvable:$true] %s473_s29 }
  0x53   :  { %572 = vmatprep.subr.mxu0 %v922_v1  ;;  %v592_v36 = vpack.c.bf16 %v310_v35, %v309_v34  ;;  %v553_v56 = vld [vmem:[#allocation8] ss:$0 sm:$0xff]  ;;  %p723_p4 = scmp.ne.s32.totalorder %s454_s5, %s722_s30  ;;  %p727_p5 = scmp.lt.s32.totalorder %s454_s5, %s454_s5 }
  0x54   :  { %p728_p6 = scmp.lt.s32.totalorder %s722_s30, %s722_s30 }
  0x55   :  { %570 = vmatmul.mubr.msk.f32.vlgmr.msra.gmra.mrb[0].mxu0 %vm102_vm1, %v91_v5  ;;  %593 = vmatpush3.bf16.msra.mxu1 %v592_v36 }
  0x56   :  { %573 = vmatpush3.msra.mxu0 %v180_v6  ;;  %574 = vmatprep.mubr.msk.f32.mxu0 %vm921_vm0, %v922_v1  ;;  %p729_p7 = por %p728_p6, %p727_p5 }
  0x57   :  { %594 = vmatprep.subr.bf16.mxu1 %v920_v0 }
  0x58   :  { %p730_p8 = pnand %p729_p7, %p723_p4 }
  0x59   :  { %575 = vmatmul.mubr.msk.f32.vlgmr.msra.gmra.mrb[2].mxu0 %vm188_vm2, %v92_v7  ;;  %596 = vmatpush3.bf16.msra.mxu1 %v595_v41 }
 0x128   :  { %v172_v9 = vpop.f32.mrb[0].mxu0 }
 0x129   :  { %v173_v10 = vadd.f32 %v549_v8, %v172_v9  ;;  %v571_v11 = vpop.f32.mrb[1].mxu0 }
 0x12b   :  { %v176_v12 = vmul.f32 0.5, %v173_v10 }
 0x12c   :  { %v258_v13 = vpop.f32.mrb[2].mxu0 }
 0x12d   :  { %616 = vtanh.f32 %v176_v12  ;;  %v576_v14 = vpop.f32.mrb[3].mxu0  ;;  %v259_v19 = vadd.f32 %v551_v16, %v258_v13 }
 0x12f   :  { %v280_v21 = vmul.f32 %v259_v19, %v259_v19 }
 0x131   :  { %v281_v27 = vsel %vm263_vm3, %v280_v21, 0.0 }
 0x137   :  { %v617_v15 = vpop.eup %616 }
 0x138   :  { %v178_v17 = vadd.f32 1.0, %v617_v15 }
 0x13a   :  { %v179_v18 = vmul.f32 0.5, %v178_v17 }
 0x13c   :  { %v262_v20 = vmul.f32 %v179_v18, %v179_v18 }
 0x13e   :  { %271 = vrot.lane.b32.xlu0 %v262_v20, %s923_s19  ;;  %v264_v22 = vsel %vm263_vm3, %v262_v20, 0.0 }
 0x142   :  { %288 = vrot.lane.b32.xlu0 %v280_v21, %s923_s19 }
 0x161   :  { %265 = vadd.xlane.f32.xlu0 %v264_v22 }
 0x1b0   :  { %v272_v23 = vpop.permute.xlu0 %271 }
 0x1b1   :  { %v274_v24 = vsel %vm263_vm3, %v272_v23, 0.0 }
 0x1b2   :  { %275 = vadd.xlane.f32.xlu1 %v274_v24 }
 0x1b4   :  { %v289_v25 = vpop.permute.xlu0 %288 }
 0x1b5   :  { %v291_v26 = vsel %vm263_vm3, %v289_v25, 0.0 }
 0x1b6   :  { %292 = vadd.xlane.f32.xlu1 %v291_v26 }
 0x1ba   :  { %282 = vadd.xlane.f32.xlu1 %v281_v27 }
 0x1ee   :  { %v266_v28 = vpop.xlane.xlu0 %265 }
 0x1ef   :  { %v267_v29 = vmax.f32 %v266_v28, 1e-24 }
 0x1f1   :  { %618 = vrsqrt.f32 %v267_v29 }
 0x1fb   :  { %v619_v30 = vpop.eup %618 }
 0x1fc   :  { %v269_v31 = vmul.f32 %v619_v30, %v179_v18 }
 0x1fe   :  { %421 = vst.msk [vmem:[#allocation10] sm:$0xff] %vm263_vm3, %v269_v31 }
 0x23f   :  { %v276_v32 = vpop.xlane.xlu1 %275 }
 0x240   :  { %v277_v33 = vmax.f32 %v276_v32, 1e-24 }
 0x242   :  { %620 = vrsqrt.f32 %v277_v33 }
 0x243   :  { %v293_v37 = vpop.xlane.xlu1 %292 }
 0x244   :  { %v294_v38 = vmax.f32 %v293_v37, 1e-24 }
 0x246   :  { %622 = vrsqrt.f32 %v294_v38 }
 0x247   :  { %v283_v42 = vpop.xlane.xlu1 %282 }
 0x248   :  { %v284_v43 = vmax.f32 %v283_v42, 1e-24 }
 0x24a   :  { %624 = vrsqrt.f32 %v284_v43 }
 0x24c   :  { %v621_v44 = vpop.eup %620 }
 0x24d   :  { %v279_v45 = vmul.f32 %v621_v44, %v179_v18 }
 0x24f   :  { %298 = vrot.lane.b32.xlu1 %v279_v45, %s923_s19 }
 0x250   :  { %v623_v46 = vpop.eup %622 }
 0x251   :  { %v296_v47 = vmul.f32 %v623_v46, %v259_v19 }
 0x253   :  { %304 = vrot.lane.b32.xlu1 %v296_v47, %s923_s19 }
 0x254   :  { %v625_v48 = vpop.eup %624 }
 0x255   :  { %v286_v49 = vmul.f32 %v625_v48, %v259_v19 }
 0x257   :  { %423 = vst.msk [vmem:[#allocation13] sm:$0xff] %vm263_vm3, %v286_v49 }
 0x2c1   :  { %v299_v50 = vpop.permute.xlu1 %298 }
 0x2c2   :  { %v301_v51 = vadd.f32 %v299_v50, %v269_v31  ;;  %422 = vst.msk [vmem:[#allocation11] sm:$0xff] %vm263_vm3, %v299_v50 }
 0x2c4   :  { %v302_v52 = vadd.f32 %v301_v51, %v286_v49 }
 0x2c5   :  { %v305_v53 = vpop.permute.xlu1 %304 }
 0x2c6   :  { %v307_v54 = vadd.f32 %v305_v53, %v302_v52  ;;  %424 = vst.msk [vmem:[#allocation14] sm:$0xff] %vm263_vm3, %v305_v53 }
 0x2c8   :  { %v308_v55 = vmul.f32 0.25, %v307_v54 }
 0x2ca   :  { %425 = vst.msk [vmem:[#allocation16] sm:$0xff] %vm263_vm3, %v308_v55  ;;  %586 = vmatmul.mubr.msk.f32.vlgmr.msra.gmra.mrb[0].mxu1 %vm263_vm3, %v308_v55 }
 0x39d   :  { %v389_v57 = vpop.f32.mrb[0].mxu1 }
 0x39e   :  { %v1093_v58 = vadd.f32 %v553_v56, %v389_v57  ;;  %v587_v59 = vpop.f32.mrb[1].mxu1 }
 0x3a0   :  { %v400_v60 = vand.u32 2147483647, %v1093_v58  ;;  %v393_v61 = vmul.f32 1.442695, %v1093_v58  ;;  %v417_v5 = vmul.f32 0.5, %v1093_v58  ;;  %v397_v12 = vmax.f32 %v1093_v58, 0.0 }
 0x3a2   :  { %v401_v62 = vsub.f32 0.0, %v400_v60  ;;  %626 = vpow2.f32 %v393_v61 }
 0x3a4   :  { %v402_v63 = vmul.f32 1.442695, %v401_v62 }
 0x3a6   :  { %628 = vpow2.f32 %v402_v63 }
 0x3ac   :  { %v627_v0 = vpop.eup %626 }
 0x3ad   :  { %v395_v1 = vmax.f32 %v627_v0, 1e-05 }
 0x3af   :  { %v396_v3 = vmin.f32 %v395_v1, 1000000.0 }
 0x3b0   :  { %v629_v2 = vpop.eup %628 }
 0x3b1   :  { %v404_v4 = vadd.f32 1.0, %v629_v2  ;;  %426 = vst.msk [vmem:[#allocation17] sm:$0xff] %vm263_vm3, %v396_v3  ;;  %v407_v6 = vmul.f32 -0.5, %v629_v2  ;;  %v410_v8 = vand.u32 2147483647, %v629_v2 }
 0x3b3   :  { %630 = vlog2.f32 %v404_v4  ;;  %v408_v7 = vadd.f32 1.0, %v407_v6  ;;  %vm1102_vm4 = vcmp.lt.f32.partialorder %v410_v8, 0.0004427343 }
 0x3b4   :  { %632 = vtanh.f32 %v417_v5 }
 0x3b5   :  { %v409_v11 = vmul.f32 %v629_v2, %v408_v7 }
 0x3bd   :  { %v631_v9 = vpop.eup %630 }
 0x3be   :  { %v406_v10 = vmul.f32 0.6931472, %v631_v9 }
 0x3bf   :  { %733 = shalt.err (!%p730_p8)
}
 0x3c0   :  { %s734_s18 = scalar_lea.hbm %s1224_s9, 128 }
 0x3c1   :  { %p735_p9 = scmp.ne.s32.totalorder %s1224_s9, %s734_s18  ;;  %p738_p10 = scmp.lt.u32.totalorder %s734_s18, %s1224_s9 }
 0x3c3   :  { %p740_p11 = pnand %p738_p10, %p735_p9 }
 0x3c5   :  { %743 = shalt.err (!%p740_p11)
}
 0x3c6   :  { %456 = dma.vmem_to_hbm [thread:$0]  %s454_s5, 128, %s1224_s9, [#allocation12]   ;;  %v412_v14 = vsel %vm1102_vm4, %v409_v11, %v406_v10 }
 0x3c7   :  { %s744_s7 = scalar_lea.vmem %s1099_s29, 128  ;;  %p749_p13 = scmp.lt.s32.totalorder %s1099_s29, %s1099_s29 }
 0x3c8   :  { %p745_p12 = scmp.ne.s32.totalorder %s1099_s29, %s744_s7  ;;  %p750_p0 = scmp.lt.s32.totalorder %s744_s7, %s744_s7 }
 0x3ca   :  { %p751_p1 = por %p750_p0, %p749_p13 }
 0x3cc   :  { %p752_p2 = pnand %p751_p1, %p745_p12 }
 0x3ce   :  { %755 = shalt.err (!%p752_p2)
}
 0x3cf   :  { %s756_s25 = scalar_lea.hbm %s1226_s11, 128 }
 0x3d0   :  { %p757_p3 = scmp.ne.s32.totalorder %s1226_s11, %s756_s25  ;;  %p760_p4 = scmp.lt.u32.totalorder %s756_s25, %s1226_s11 }
 0x3d2   :  { %p762_p5 = pnand %p760_p4, %p757_p3 }
 0x3d4   :  { %765 = shalt.err (!%p762_p5)
}
 0x3d5   :  { %476 = dma.vmem_to_hbm [thread:$0]  %s1099_s29, 128, %s1226_s11, [#allocation15]   ;;  %v413_v15 = vadd.f32 %v412_v14, %v397_v12  ;;  %vm398_vm5 = vcmp.ne.f32.partialorder %v1093_v58, %v1093_v58  ;;  %v633_v16 = vpop.eup %632 }
 0x3d6   :  { %s926_s5 = smov [#allocation17]   ;;  %s927_s30 = smov [#allocation10]  }
 0x3d7   :  { %s493_s27 = sshll.u32 %s926_s5, 4  ;;  %s443_s16 = sshll.u32 %s927_s30, 4  ;;  %v414_v17 = vsel %vm398_vm5, %v1093_v58, %v413_v15  ;;  %s494_s27 = int_to_ptr.vmem [resolvable:$true] %s493_s27  ;;  %s444_s16 = int_to_ptr.vmem [resolvable:$true] %s443_s16 }
 0x3d8   :  { %v415_v18 = vmax.f32 %v414_v17, 0.0001  ;;  %s766_s17 = scalar_lea.vmem %s494_s27, 128  ;;  %p771_p7 = scmp.lt.s32.totalorder %s494_s27, %s494_s27 }
 0x3d9   :  { %p767_p6 = scmp.ne.s32.totalorder %s494_s27, %s766_s17  ;;  %p772_p8 = scmp.lt.s32.totalorder %s766_s17, %s766_s17 }
 0x3db   :  { %p773_p9 = por %p772_p8, %p771_p7 }
 0x3dd   :  { %p774_p10 = pnand %p773_p9, %p767_p6 }
 0x3df   :  { %777 = shalt.err (!%p774_p10)
}
 0x3e0   :  { %s778_s18 = scalar_lea.hbm %s1228_s13, 128 }
 0x3e1   :  { %p779_p11 = scmp.ne.s32.totalorder %s1228_s13, %s778_s18  ;;  %p782_p12 = scmp.lt.u32.totalorder %s778_s18, %s1228_s13 }
 0x3e3   :  { %p784_p13 = pnand %p782_p12, %p779_p11 }
 0x3e5   :  { %787 = shalt.err (!%p784_p13)
}
 0x3e6   :  { %496 = dma.vmem_to_hbm [thread:$0]  %s494_s27, 128, %s1228_s13, [#allocation18]  }
 0x3e7   :  { %s788_s7 = scalar_lea.vmem %s444_s16, 128  ;;  %p793_p1 = scmp.lt.s32.totalorder %s444_s16, %s444_s16 }
 0x3e8   :  { %p789_p0 = scmp.ne.s32.totalorder %s444_s16, %s788_s7  ;;  %p794_p2 = scmp.lt.s32.totalorder %s788_s7, %s788_s7 }
 0x3ea   :  { %p795_p3 = por %p794_p2, %p793_p1 }
 0x3ec   :  { %p796_p4 = pnand %p795_p3, %p789_p0 }
 0x3ee   :  { %799 = shalt.err (!%p796_p4)
}
 0x3ef   :  { %s800_s25 = scalar_lea.hbm %s1223_s8, 128 }
 0x3f0   :  { %p801_p5 = scmp.ne.s32.totalorder %s1223_s8, %s800_s25  ;;  %p804_p6 = scmp.lt.u32.totalorder %s800_s25, %s1223_s8 }
 0x3f2   :  { %p806_p7 = pnand %p804_p6, %p801_p5 }
 0x3f4   :  { %809 = shalt.err (!%p806_p7)
}
 0x3f5   :  { %446 = dma.vmem_to_hbm [thread:$0]  %s444_s16, 128, %s1223_s8, [#allocation4]   ;;  %v416_v19 = vmin.f32 %v415_v18, 10000.0  ;;  %v419_v20 = vadd.f32 1.0, %v633_v16 }
 0x3f6   :  { %s928_s3 = smov [#allocation13]   ;;  %s929_s27 = smov [#allocation16]  }
 0x3f7   :  { %s463_s5 = sshll.u32 %s928_s3, 4  ;;  %s483_s30 = sshll.u32 %s929_s27, 4  ;;  %428 = vrot.lane.b32.xlu1 %v416_v19, %s923_s19  ;;  %s464_s5 = int_to_ptr.vmem [resolvable:$true] %s463_s5  ;;  %s484_s30 = int_to_ptr.vmem [resolvable:$true] %s483_s30 }
 0x3f8   :  { %s810_s17 = scalar_lea.vmem %s464_s5, 128  ;;  %p815_p9 = scmp.lt.s32.totalorder %s464_s5, %s464_s5 }
 0x3f9   :  { %p811_p8 = scmp.ne.s32.totalorder %s464_s5, %s810_s17  ;;  %p816_p10 = scmp.lt.s32.totalorder %s810_s17, %s810_s17 }
 0x3fb   :  { %p817_p11 = por %p816_p10, %p815_p9 }
 0x3fd   :  { %p818_p12 = pnand %p817_p11, %p811_p8 }
 0x3ff   :  { %821 = shalt.err (!%p818_p12)
}
 0x400   :  { %s822_s8 = scalar_lea.hbm %s1225_s10, 128 }
 0x401   :  { %p823_p13 = scmp.ne.s32.totalorder %s1225_s10, %s822_s8  ;;  %p826_p0 = scmp.lt.u32.totalorder %s822_s8, %s1225_s10 }
 0x403   :  { %p828_p1 = pnand %p826_p0, %p823_p13 }
 0x405   :  { %831 = shalt.err (!%p828_p1)
}
 0x406   :  { %466 = dma.vmem_to_hbm [thread:$0]  %s464_s5, 128, %s1225_s10, [#allocation12]   ;;  %v420_v21 = vmul.f32 0.5, %v419_v20 }
 0x407   :  { %s832_s22 = scalar_lea.vmem %s484_s30, 128  ;;  %p837_p3 = scmp.lt.s32.totalorder %s484_s30, %s484_s30 }
 0x408   :  { %p833_p2 = scmp.ne.s32.totalorder %s484_s30, %s832_s22  ;;  %p838_p4 = scmp.lt.s32.totalorder %s832_s22, %s832_s22 }
 0x40a   :  { %p839_p5 = por %p838_p4, %p837_p3 }
 0x40c   :  { %p840_p6 = pnand %p839_p5, %p833_p2 }
 0x40e   :  { %843 = shalt.err (!%p840_p6)
}
 0x40f   :  { %s844_s7 = scalar_lea.hbm %s1227_s12, 128 }
 0x410   :  { %p845_p7 = scmp.ne.s32.totalorder %s1227_s12, %s844_s7  ;;  %p848_p8 = scmp.lt.u32.totalorder %s844_s7, %s1227_s12 }
 0x412   :  { %p850_p9 = pnand %p848_p8, %p845_p7 }
 0x414   :  { %853 = shalt.err (!%p850_p9)
}
 0x415   :  { %486 = dma.vmem_to_hbm [thread:$0]  %s484_s30, 128, %s1227_s12, [#allocation15]  }
 0x416   :  { %s930_s9 = smov 64   ;;  %s931_s2 = smov [#allocation19]  }
 0x417   :  { %433 = vrot.lane.b32.xlu1 %v420_v21, %s930_s9  ;;  %s503_s13 = sshll.u32 %s931_s2, 4  ;;  %s932_s4 = smov [#allocation20]   ;;  %s504_s13 = int_to_ptr.vmem [resolvable:$true] %s503_s13 }
 0x418   :  { %s513_s3 = sshll.u32 %s932_s4, 4  ;;  %s854_s5 = scalar_lea.vmem %s504_s13, 128  ;;  %s514_s3 = int_to_ptr.vmem [resolvable:$true] %s513_s3 }
 0x419   :  { %p855_p10 = scmp.ne.s32.totalorder %s504_s13, %s854_s5  ;;  %p859_p11 = scmp.lt.s32.totalorder %s504_s13, %s504_s13 }
 0x41a   :  { %p860_p12 = scmp.lt.s32.totalorder %s854_s5, %s854_s5 }
 0x41c   :  { %p861_p13 = por %p860_p12, %p859_p11 }
 0x41e   :  { %p862_p0 = pnand %p861_p13, %p855_p10 }
 0x469   :  { %v429_v22 = vpop.permute.xlu1 %428 }
 0x46a   :  { %431 = vst.msk [vmem:[#allocation19] sm:$0xff] %vm263_vm3, %v429_v22 }
 0x46b   :  { %865 = shalt.err (!%p862_p0)
}
 0x46c   :  { %s866_s12 = scalar_lea.hbm %s1229_s14, 128 }
 0x46d   :  { %p867_p1 = scmp.ne.s32.totalorder %s1229_s14, %s866_s12  ;;  %p870_p2 = scmp.lt.u32.totalorder %s866_s12, %s1229_s14 }
 0x46f   :  { %p872_p3 = pnand %p870_p2, %p867_p1 }
 0x471   :  { %875 = shalt.err (!%p872_p3)
}
 0x472   :  { %506 = dma.vmem_to_hbm [thread:$0]  %s504_s13, 128, %s1229_s14, [#allocation18]  }
 0x473   :  { %s876_s20 = scalar_lea.vmem %s514_s3, 128  ;;  %p881_p5 = scmp.lt.s32.totalorder %s514_s3, %s514_s3 }
 0x474   :  { %p877_p4 = scmp.ne.s32.totalorder %s514_s3, %s876_s20  ;;  %p882_p6 = scmp.lt.s32.totalorder %s876_s20, %s876_s20 }
 0x476   :  { %p883_p7 = por %p882_p6, %p881_p5 }
 0x478   :  { %p884_p8 = pnand %p883_p7, %p877_p4 }
 0x489   :  { %v434_v23 = vpop.permute.xlu1 %433 }
 0x48a   :  { %436 = vst.msk [vmem:[#allocation20] sm:$0xff] %vm263_vm3, %v434_v23 }
 0x48b   :  { %887 = shalt.err (!%p884_p8)
}
 0x48c   :  { %s888_s28 = scalar_lea.hbm %s1230_s15, 128 }
 0x48d   :  { %p889_p9 = scmp.ne.s32.totalorder %s1230_s15, %s888_s28  ;;  %p892_p10 = scmp.lt.u32.totalorder %s888_s28, %s1230_s15 }
 0x48f   :  { %p894_p11 = pnand %p892_p10, %p889_p9 }
 0x491   :  { %897 = shalt.err (!%p894_p11)
}
 0x492   :  { %516 = dma.vmem_to_hbm [thread:$0]  %s514_s3, 128, %s1230_s15, [#allocation21]  }
 0x493   :  { %904 = dma.done.wait [#allocation4], 128  }
 0x494   :  { %905 = vsyncadd [#allocation4], 4294967168 }
 0x495   :  { %906 = dma.done.wait [#allocation12], 256  }
 0x496   :  { %907 = vsyncadd [#allocation12], 4294967040 }
 0x497   :  { %908 = dma.done.wait [#allocation15], 256  }
 0x498   :  { %909 = vsyncadd [#allocation15], 4294967040 }
 0x499   :  { %910 = dma.done.wait [#allocation18], 256  }
 0x49a   :  { %911 = vsyncadd [#allocation18], 4294967040 }
 0x49b   :  { %912 = dma.done.wait [#allocation21], 128  }
 0x49c   :  { %913 = vsyncadd [#allocation21], 4294967168 }
 0x49d   :  { %541 = vsyncpa [#allocation3], 1 }
 0x49e   :  { %542 = vsyncpa [#allocation6], 1 }
 0x49f   :  { %543 = vsyncpa [#allocation9], 1 }
 0x4a0   :  { %544 = vsyncpa [#allocation4], 1 }
 0x4a1   :  { %545 = vsyncpa [#allocation12], 1 }
 0x4a2   :  { %546 = vsyncpa [#allocation15], 1 }
 0x4a3   :  { %547 = vsyncpa [#allocation18], 1 }
 0x4a4   :  { %548 = vsyncpa [#allocation21], 1 }

</bundles_post_ra>
